<compile_context>
chip_gen: v6e
topology: v6e:2x2x1
jax: 0.10.0
libtpu: 0.0.40
codegen_flags: <defaults>
</compile_context>

<pallas_src>
import math

import jax
import jax.numpy as jnp
from jax.experimental import pallas as pl
from jax.experimental.pallas import tpu as pltpu


def _round_up(a, m):
    return ((a + m - 1) // m) * m


def make_relu_pe_kernel(L, num_layers):
    """Kernel closure for a fixed (L, num_layers) configuration."""
    n_blocks = 1 + 2 * L

    def kernel(x_ref, *refs):
        out_ref = refs[-1]
        w0_blocks = refs[:n_blocks]          # (1+2L) refs, each (C, H0)
        b0_ref = refs[n_blocks]              # (1, H0)
        rest = refs[n_blocks + 1:-1]         # (w1_t, b1, ..., w_{n-1}_t, b_{n-1})

        x = x_ref[...]                       # (TILE_B, C), f32

        # ---- first layer, positional encoding fused into pre-split w0 ----
        h = jnp.dot(x, w0_blocks[0][...], preferred_element_type=jnp.float32)
        h = h + b0_ref[...]

        if L >= 1:
            two_pi = 2.0 * math.pi
            c = jnp.cos(two_pi * x)          # cos(2^1 * pi * x)
            s = jnp.sin(two_pi * x)          # sin(2^1 * pi * x)
            h = h + jnp.dot(c, w0_blocks[1][...], preferred_element_type=jnp.float32)
            h = h + jnp.dot(s, w0_blocks[2][...], preferred_element_type=jnp.float32)
            for i in range(2, L + 1):
                # angle doubling: theta_i = 2 * theta_{i-1}
                c_new = 2.0 * c * c - 1.0
                s_new = 2.0 * s * c
                c, s = c_new, s_new
                h = h + jnp.dot(c, w0_blocks[2 * i - 1][...],
                                preferred_element_type=jnp.float32)
                h = h + jnp.dot(s, w0_blocks[2 * i][...],
                                preferred_element_type=jnp.float32)

        # ---- remaining layers: ReLU then Linear; last layer has no ReLU ----
        for li in range(num_layers - 1):
            h = jnp.maximum(h, 0.0)
            w = rest[2 * li][...]            # (H_in, H_out)
            b = rest[2 * li + 1][...]        # (1, H_out)
            h = jnp.dot(h, w, preferred_element_type=jnp.float32) + b

        out_ref[...] = h.astype(out_ref.dtype)

    return kernel


def relu_pe_forward(x, weights, biases, L, tile_b=None):
    """Pallas forward.  weights[i]: (out_i, in_i) torch layout; biases[i]: (out_i,)."""
    B, C = x.shape
    num_layers = len(weights)
    out_dim = weights[-1].shape[0]
    H0 = weights[0].shape[0]
    n_blocks = 1 + 2 * L

    if tile_b is None:
        tile_b = min(512, _round_up(B, 8))
    B_pad = _round_up(B, tile_b)

    x_f32 = jnp.asarray(x, jnp.float32)
    if B_pad != B:
        x_f32 = jnp.pad(x_f32, ((0, B_pad - B), (0, 0)))

    args = [x_f32]
    in_specs = [pl.BlockSpec((tile_b, C), lambda i: (i, 0))]

    # First weight: pre-transpose to (C*(1+2L), H0) and pre-split into
    # (1+2L) aligned (C, H0) row blocks (feature-major PE ordering).
    w0_t = jnp.asarray(weights[0], jnp.float32).T
    for j in range(n_blocks):
        blk = w0_t[j * C:(j + 1) * C, :]
        args.append(blk)
        in_specs.append(pl.BlockSpec((C, H0), lambda i: (0, 0)))
    b0 = jnp.asarray(biases[0], jnp.float32).reshape(1, -1)
    args.append(b0)
    in_specs.append(pl.BlockSpec((1, H0), lambda i: (0, 0)))

    # Remaining layers: pre-transposed weights + row-vector biases,
    # VMEM-resident across all grid steps.
    for li in range(1, num_layers):
        w_t = jnp.asarray(weights[li], jnp.float32).T
        b = jnp.asarray(biases[li], jnp.float32).reshape(1, -1)
        args.append(w_t)
        in_specs.append(pl.BlockSpec(w_t.shape, lambda i: (0, 0)))
        args.append(b)
        in_specs.append(pl.BlockSpec(b.shape, lambda i: (0, 0)))

    kernel = make_relu_pe_kernel(L, num_layers)

    out = pl.pallas_call(
        kernel,
        out_shape=jax.ShapeDtypeStruct((B_pad, out_dim), jnp.float32),
        grid=(B_pad // tile_b,),
        in_specs=in_specs,
        out_specs=pl.BlockSpec((tile_b, out_dim), lambda i: (i, 0)),
        compiler_params=pltpu.CompilerParams(
            dimension_semantics=("parallel",),
            vmem_limit_bytes=32 * 1024 * 1024,
        ),
    )(*args)

    return out[:B]


def reference_forward(x, weights, biases, L):
    """Pure-JAX reference mirroring the PyTorch forward (get_gradient=False)."""
    B, C = x.shape
    feats = [x[:, :, None]]
    for i in range(1, L + 1):
        freq = (2.0 ** i) * math.pi
        feats.append(jnp.cos(freq * x)[:, :, None])
        feats.append(jnp.sin(freq * x)[:, :, None])
    pe = jnp.concatenate(feats, axis=2)                      # (B, C, 1+2L)
    pe = jnp.transpose(pe, (0, 2, 1)).reshape(B, -1)         # (B, C*(1+2L))
    h = pe
    for i in range(len(weights) - 1):
        h = jnp.maximum(h @ weights[i].T + biases[i], 0.0)
    return h @ weights[-1].T + biases[-1]


if __name__ == "__main__":
    # Small config: dims=[4, 32, 32, 4], L=2  ->  PE input dim = 4 + 4*2*2 = 20
    dims = [4, 32, 32, 4]
    L = 2
    B = 16
    C = dims[0]

    layer_dims = list(dims)
    layer_dims[0] = dims[0] + dims[0] * 2 * L   # as in the module __init__

    key = jax.random.PRNGKey(0)
    keys = jax.random.split(key, 2 * len(layer_dims))
    kk = iter(keys)

    weights, biases = [], []
    for i in range(len(layer_dims) - 1):
        fan_in = layer_dims[i]
        bound = 1.0 / math.sqrt(fan_in)
        w = jax.random.uniform(next(kk), (layer_dims[i + 1], layer_dims[i]),
                               jnp.float32, minval=-bound, maxval=bound)
        b = jax.random.uniform(next(kk), (layer_dims[i + 1],),
                               jnp.float32, minval=-bound, maxval=bound)
        weights.append(w)
        biases.append(b)

    x = jax.random.uniform(next(kk), (B, C), jnp.float32, minval=-1.0, maxval=1.0)

    # tile_b=8 exercises a multi-step batch grid even at this small B.
    out = jax.block_until_ready(relu_pe_forward(x, weights, biases, L, tile_b=8))
    ref = reference_forward(x, weights, biases, L)

    assert out.shape == (B, dims[-1]), out.shape
    if not bool(jnp.allclose(out, ref, atol=1e-4, rtol=1e-4)):
        raise AssertionError("Pallas kernel output does not match JAX reference")

    print("KERNEL_OK")
</pallas_src>

<mosaic_0001>
module attributes {stable_mosaic.version = 11 : i64} {
  func.func @kernel(%arg0: i32, %arg1: memref<8x4xf32, #tpu.memory_space<vmem>>, %arg2: memref<4x32xf32, #tpu.memory_space<vmem>>, %arg3: memref<4x32xf32, #tpu.memory_space<vmem>>, %arg4: memref<4x32xf32, #tpu.memory_space<vmem>>, %arg5: memref<4x32xf32, #tpu.memory_space<vmem>>, %arg6: memref<4x32xf32, #tpu.memory_space<vmem>>, %arg7: memref<1x32xf32, #tpu.memory_space<vmem>>, %arg8: memref<32x32xf32, #tpu.memory_space<vmem>>, %arg9: memref<1x32xf32, #tpu.memory_space<vmem>>, %arg10: memref<32x4xf32, #tpu.memory_space<vmem>>, %arg11: memref<1x4xf32, #tpu.memory_space<vmem>>, %arg12: memref<8x4xf32, #tpu.memory_space<vmem>>) attributes {dimension_semantics = [#tpu.dimension_semantics<parallel>], iteration_bounds = array<i64: 2>, scalar_prefetch = 0 : i64, scratch_operands = 0 : i64, tpu.core_type = #tpu.core_type<tc>, window_params = [{transform_indices = @transform_0, window_bounds = array<i64: 8, 4>}, {pipeline_mode = #tpu.pipeline_mode<synchronous>, transform_indices = @transform_1, window_bounds = array<i64: 4, 32>}, {pipeline_mode = #tpu.pipeline_mode<synchronous>, transform_indices = @transform_2, window_bounds = array<i64: 4, 32>}, {pipeline_mode = #tpu.pipeline_mode<synchronous>, transform_indices = @transform_3, window_bounds = array<i64: 4, 32>}, {pipeline_mode = #tpu.pipeline_mode<synchronous>, transform_indices = @transform_4, window_bounds = array<i64: 4, 32>}, {pipeline_mode = #tpu.pipeline_mode<synchronous>, transform_indices = @transform_5, window_bounds = array<i64: 4, 32>}, {pipeline_mode = #tpu.pipeline_mode<synchronous>, transform_indices = @transform_6, window_bounds = array<i64: 1, 32>}, {pipeline_mode = #tpu.pipeline_mode<synchronous>, transform_indices = @transform_7, window_bounds = array<i64: 32, 32>}, {pipeline_mode = #tpu.pipeline_mode<synchronous>, transform_indices = @transform_8, window_bounds = array<i64: 1, 32>}, {pipeline_mode = #tpu.pipeline_mode<synchronous>, transform_indices = @transform_9, window_bounds = array<i64: 32, 4>}, {pipeline_mode = #tpu.pipeline_mode<synchronous>, transform_indices = @transform_10, window_bounds = array<i64: 1, 4>}, {transform_indices = @transform_11, window_bounds = array<i64: 8, 4>}]} {
    %c0 = arith.constant 0 : index
    %c0_0 = arith.constant 0 : index
    %0 = vector.load %arg1[%c0, %c0_0] : memref<8x4xf32, #tpu.memory_space<vmem>>, vector<8x4xf32>
    %c0_1 = arith.constant 0 : index
    %c0_2 = arith.constant 0 : index
    %1 = vector.load %arg2[%c0_1, %c0_2] : memref<4x32xf32, #tpu.memory_space<vmem>>, vector<4x32xf32>
    %cst = arith.constant dense<0.000000e+00> : vector<8x32xf32>
    %2 = tpu.matmul %0, %1, %cst {dimension_numbers = #tpu.dot_dimension_numbers<[1], [0], [0], [1], [0, 0, 1, 1], [], []>} : vector<8x4xf32>, vector<4x32xf32>, vector<8x32xf32> -> vector<8x32xf32>
    %c0_3 = arith.constant 0 : index
    %c0_4 = arith.constant 0 : index
    %3 = vector.load %arg7[%c0_3, %c0_4] : memref<1x32xf32, #tpu.memory_space<vmem>>, vector<1x32xf32>
    %4 = vector.broadcast %3 : vector<1x32xf32> to vector<8x32xf32>
    %5 = arith.addf %2, %4 : vector<8x32xf32>
    %cst_5 = arith.constant 6.28318548 : f32
    %6 = vector.broadcast %cst_5 : f32 to vector<8x4xf32>
    %7 = arith.mulf %6, %0 : vector<8x4xf32>
    %8 = math.cos %7 : vector<8x4xf32>
    %cst_6 = arith.constant 6.28318548 : f32
    %9 = vector.broadcast %cst_6 : f32 to vector<8x4xf32>
    %10 = arith.mulf %9, %0 : vector<8x4xf32>
    %11 = math.sin %10 : vector<8x4xf32>
    %c0_7 = arith.constant 0 : index
    %c0_8 = arith.constant 0 : index
    %12 = vector.load %arg3[%c0_7, %c0_8] : memref<4x32xf32, #tpu.memory_space<vmem>>, vector<4x32xf32>
    %cst_9 = arith.constant dense<0.000000e+00> : vector<8x32xf32>
    %13 = tpu.matmul %8, %12, %cst_9 {dimension_numbers = #tpu.dot_dimension_numbers<[1], [0], [0], [1], [0, 0, 1, 1], [], []>} : vector<8x4xf32>, vector<4x32xf32>, vector<8x32xf32> -> vector<8x32xf32>
    %14 = arith.addf %5, %13 : vector<8x32xf32>
    %c0_10 = arith.constant 0 : index
    %c0_11 = arith.constant 0 : index
    %15 = vector.load %arg4[%c0_10, %c0_11] : memref<4x32xf32, #tpu.memory_space<vmem>>, vector<4x32xf32>
    %cst_12 = arith.constant dense<0.000000e+00> : vector<8x32xf32>
    %16 = tpu.matmul %11, %15, %cst_12 {dimension_numbers = #tpu.dot_dimension_numbers<[1], [0], [0], [1], [0, 0, 1, 1], [], []>} : vector<8x4xf32>, vector<4x32xf32>, vector<8x32xf32> -> vector<8x32xf32>
    %17 = arith.addf %14, %16 : vector<8x32xf32>
    %cst_13 = arith.constant 2.000000e+00 : f32
    %18 = vector.broadcast %cst_13 : f32 to vector<8x4xf32>
    %19 = arith.mulf %18, %8 : vector<8x4xf32>
    %20 = arith.mulf %19, %8 : vector<8x4xf32>
    %cst_14 = arith.constant 1.000000e+00 : f32
    %21 = vector.broadcast %cst_14 : f32 to vector<8x4xf32>
    %22 = arith.subf %20, %21 : vector<8x4xf32>
    %cst_15 = arith.constant 2.000000e+00 : f32
    %23 = vector.broadcast %cst_15 : f32 to vector<8x4xf32>
    %24 = arith.mulf %23, %11 : vector<8x4xf32>
    %25 = arith.mulf %24, %8 : vector<8x4xf32>
    %c0_16 = arith.constant 0 : index
    %c0_17 = arith.constant 0 : index
    %26 = vector.load %arg5[%c0_16, %c0_17] : memref<4x32xf32, #tpu.memory_space<vmem>>, vector<4x32xf32>
    %cst_18 = arith.constant dense<0.000000e+00> : vector<8x32xf32>
    %27 = tpu.matmul %22, %26, %cst_18 {dimension_numbers = #tpu.dot_dimension_numbers<[1], [0], [0], [1], [0, 0, 1, 1], [], []>} : vector<8x4xf32>, vector<4x32xf32>, vector<8x32xf32> -> vector<8x32xf32>
    %28 = arith.addf %17, %27 : vector<8x32xf32>
    %c0_19 = arith.constant 0 : index
    %c0_20 = arith.constant 0 : index
    %29 = vector.load %arg6[%c0_19, %c0_20] : memref<4x32xf32, #tpu.memory_space<vmem>>, vector<4x32xf32>
    %cst_21 = arith.constant dense<0.000000e+00> : vector<8x32xf32>
    %30 = tpu.matmul %25, %29, %cst_21 {dimension_numbers = #tpu.dot_dimension_numbers<[1], [0], [0], [1], [0, 0, 1, 1], [], []>} : vector<8x4xf32>, vector<4x32xf32>, vector<8x32xf32> -> vector<8x32xf32>
    %31 = arith.addf %28, %30 : vector<8x32xf32>
    %cst_22 = arith.constant 0.000000e+00 : f32
    %32 = vector.broadcast %cst_22 : f32 to vector<8x32xf32>
    %33 = arith.maximumf %31, %32 : vector<8x32xf32>
    %c0_23 = arith.constant 0 : index
    %c0_24 = arith.constant 0 : index
    %34 = vector.load %arg8[%c0_23, %c0_24] : memref<32x32xf32, #tpu.memory_space<vmem>>, vector<32x32xf32>
    %c0_25 = arith.constant 0 : index
    %c0_26 = arith.constant 0 : index
    %35 = vector.load %arg9[%c0_25, %c0_26] : memref<1x32xf32, #tpu.memory_space<vmem>>, vector<1x32xf32>
    %cst_27 = arith.constant dense<0.000000e+00> : vector<8x32xf32>
    %36 = tpu.matmul %33, %34, %cst_27 {dimension_numbers = #tpu.dot_dimension_numbers<[1], [0], [0], [1], [0, 0, 1, 1], [], []>} : vector<8x32xf32>, vector<32x32xf32>, vector<8x32xf32> -> vector<8x32xf32>
    %37 = vector.broadcast %35 : vector<1x32xf32> to vector<8x32xf32>
    %38 = arith.addf %36, %37 : vector<8x32xf32>
    %cst_28 = arith.constant 0.000000e+00 : f32
    %39 = vector.broadcast %cst_28 : f32 to vector<8x32xf32>
    %40 = arith.maximumf %38, %39 : vector<8x32xf32>
    %c0_29 = arith.constant 0 : index
    %c0_30 = arith.constant 0 : index
    %41 = vector.load %arg10[%c0_29, %c0_30] : memref<32x4xf32, #tpu.memory_space<vmem>>, vector<32x4xf32>
    %c0_31 = arith.constant 0 : index
    %c0_32 = arith.constant 0 : index
    %42 = vector.load %arg11[%c0_31, %c0_32] : memref<1x4xf32, #tpu.memory_space<vmem>>, vector<1x4xf32>
    %cst_33 = arith.constant dense<0.000000e+00> : vector<8x4xf32>
    %43 = tpu.matmul %40, %41, %cst_33 {dimension_numbers = #tpu.dot_dimension_numbers<[1], [0], [0], [1], [0, 0, 1, 1], [], []>} : vector<8x32xf32>, vector<32x4xf32>, vector<8x4xf32> -> vector<8x4xf32>
    %44 = vector.broadcast %42 : vector<1x4xf32> to vector<8x4xf32>
    %45 = arith.addf %43, %44 : vector<8x4xf32>
    %c0_34 = arith.constant 0 : index
    %c0_35 = arith.constant 0 : index
    %46 = vector.load %arg12[%c0_34, %c0_35] : memref<8x4xf32, #tpu.memory_space<vmem>>, vector<8x4xf32>
    tpu.vector_store %arg12[%c0_34, %c0_35], %45 {strides = array<i32>} : memref<8x4xf32, #tpu.memory_space<vmem>>, vector<8x4xf32>,
    return
  }
  func.func @transform_0(%arg0: i32) -> (i32, i32) {
    %c0_i32 = arith.constant 0 : i32
    %c0_i32_0 = arith.constant 0 : i32
    return %arg0, %c0_i32 : i32, i32
  }
  func.func @transform_1(%arg0: i32) -> (i32, i32) {
    %c0_i32 = arith.constant 0 : i32
    %c0_i32_0 = arith.constant 0 : i32
    %c0_i32_1 = arith.constant 0 : i32
    return %c0_i32, %c0_i32_0 : i32, i32
  }
  func.func @transform_2(%arg0: i32) -> (i32, i32) {
    %c0_i32 = arith.constant 0 : i32
    %c0_i32_0 = arith.constant 0 : i32
    %c0_i32_1 = arith.constant 0 : i32
    return %c0_i32, %c0_i32_0 : i32, i32
  }
  func.func @transform_3(%arg0: i32) -> (i32, i32) {
    %c0_i32 = arith.constant 0 : i32
    %c0_i32_0 = arith.constant 0 : i32
    %c0_i32_1 = arith.constant 0 : i32
    return %c0_i32, %c0_i32_0 : i32, i32
  }
  func.func @transform_4(%arg0: i32) -> (i32, i32) {
    %c0_i32 = arith.constant 0 : i32
    %c0_i32_0 = arith.constant 0 : i32
    %c0_i32_1 = arith.constant 0 : i32
    return %c0_i32, %c0_i32_0 : i32, i32
  }
  func.func @transform_5(%arg0: i32) -> (i32, i32) {
    %c0_i32 = arith.constant 0 : i32
    %c0_i32_0 = arith.constant 0 : i32
    %c0_i32_1 = arith.constant 0 : i32
    return %c0_i32, %c0_i32_0 : i32, i32
  }
  func.func @transform_6(%arg0: i32) -> (i32, i32) {
    %c0_i32 = arith.constant 0 : i32
    %c0_i32_0 = arith.constant 0 : i32
    %c0_i32_1 = arith.constant 0 : i32
    return %c0_i32, %c0_i32_0 : i32, i32
  }
  func.func @transform_7(%arg0: i32) -> (i32, i32) {
    %c0_i32 = arith.constant 0 : i32
    %c0_i32_0 = arith.constant 0 : i32
    %c0_i32_1 = arith.constant 0 : i32
    return %c0_i32, %c0_i32_0 : i32, i32
  }
  func.func @transform_8(%arg0: i32) -> (i32, i32) {
    %c0_i32 = arith.constant 0 : i32
    %c0_i32_0 = arith.constant 0 : i32
    %c0_i32_1 = arith.constant 0 : i32
    return %c0_i32, %c0_i32_0 : i32, i32
  }
  func.func @transform_9(%arg0: i32) -> (i32, i32) {
    %c0_i32 = arith.constant 0 : i32
    %c0_i32_0 = arith.constant 0 : i32
    %c0_i32_1 = arith.constant 0 : i32
    return %c0_i32, %c0_i32_0 : i32, i32
  }
  func.func @transform_10(%arg0: i32) -> (i32, i32) {
    %c0_i32 = arith.constant 0 : i32
    %c0_i32_0 = arith.constant 0 : i32
    %c0_i32_1 = arith.constant 0 : i32
    return %c0_i32, %c0_i32_0 : i32, i32
  }
  func.func @transform_11(%arg0: i32) -> (i32, i32) {
    %c0_i32 = arith.constant 0 : i32
    %c0_i32_0 = arith.constant 0 : i32
    return %arg0, %c0_i32 : i32, i32
  }
}

</mosaic_0001>

<bundles_post_ra>
// kernel: tpu_custom_call.1
= control target key start
LH: loop header
LB: loop body
LE: loop exit
PB: predicated region body
PF: predicated region fallthrough
CT: control target
= control target key end

     0   :  { %s1419_s17 = smov 0   ;;  %s1552_s0 = inlined_call_operand.vmem [shape: f32[16,4], index: 0, kind: input, shape index: {}]   ;;  %s1553_s1 = inlined_call_operand.vmem [shape: f32[4,32], index: 1, kind: input, shape index: {}]   ;;  %s1554_s2 = inlined_call_operand.vmem [shape: f32[4,32], index: 2, kind: input, shape index: {}]   ;;  %s1555_s3 = inlined_call_operand.vmem [shape: f32[4,32], index: 3, kind: input, shape index: {}]   ;;  %s1556_s4 = inlined_call_operand.vmem [shape: f32[4,32], index: 4, kind: input, shape index: {}]   ;;  %s1557_s5 = inlined_call_operand.vmem [shape: f32[4,32], index: 5, kind: input, shape index: {}]   ;;  %s1558_s6 = inlined_call_operand.vmem [shape: f32[1,32], index: 6, kind: input, shape index: {}]   ;;  %s1559_s7 = inlined_call_operand.vmem [shape: f32[32,32], index: 7, kind: input, shape index: {}]   ;;  %s1560_s8 = inlined_call_operand.vmem [shape: f32[1,32], index: 8, kind: input, shape index: {}]   ;;  %s1561_s9 = inlined_call_operand.vmem [shape: f32[32,4], index: 9, kind: input, shape index: {}]   ;;  %s1562_s10 = inlined_call_operand.vmem [shape: f32[1,4], index: 10, kind: input, shape index: {}]   ;;  %s1563_s11 = inlined_call_operand.vmem [shape: f32[16,4], index: 11, kind: output, shape index: {}]  }
   0x1 LB: > { %s1219_s18 = sadd.s32 4294967295, %s1349_s17   ;;  %p1223_p0 = scmp.ge.s32.totalorder %s1349_s17, 1  ;;  %s1349_s17 = sphi %s1419_s17, %s21_s17  }
   0x2   : > { %p336_p1 = scmp.lt.s32.totalorder %s1349_s17, 3 }
   0x4   : > { %p337_p2 = pnand %p1223_p0, %p336_p1 }
   0x5   : > { %p374_p3 = scmp.lt.s32.totalorder (!%p337_p2), %s1219_s18, 1 }
   0x6   : > { %340 = sbr.rel (%p337_p2) target bundleno = 697 (0x2b9), region = 64 }
   0xb   : > { %v383_v0 = vld [vmem:[%s1553_s1] sm:$0xf]  ;;  %vm395_vm0 = vcmask 1043456   ;;  %v1351_v1 = vmov 0.0   ;;  %vm1352_vm1 = vmmov 0   ;;  %s1565_s18 = smov (!%p374_p3, %s1219_s18), 1 }
   0xc   : > { %1272 = vmatprep.subr.mxu0 %v1351_v1  ;;  %1274 = vmatprep.mubr.msk.f32.mxu0 %vm1352_vm1, %v1351_v1  ;;  %v677_v2 = vld [vmem:[%s1554_s2] sm:$0xf]  ;;  %s1224_s23 = sshll.u32 %s1565_s18, 3  ;;  %vm391_vm2 = vcmask 31744   ;;  %v1353_v16 = vmov 2102212464  }
   0xd   : > { %1273 = vmatpush3.msk.msra.mxu0 %vm395_vm0, %v383_v0  ;;  %1277 = vmatprep.subr.mxu1 %v1351_v1  ;;  %s377_s26 = scalar_lea.vmem %s1552_s0, %s1224_s23  ;;  %v755_v3 = vld [vmem:[%s1555_s3] sm:$0xf]  ;;  %v1354_v18 = vmov 920167782   ;;  %v1355_v21 = vmov 683565275   ;;  %s381_s25 = scalar_lea.vmem %s1563_s11, %s1224_s23 }
   0xe   : > { %1278 = vmatpush3.msk.msra.mxu1 %vm395_vm0, %v677_v2  ;;  %1279 = vmatprep.mubr.msk.f32.mxu1 %vm1352_vm1, %v1351_v1  ;;  %v382_v4 = vld [vmem:[%s377_s26] sm:$0xff]  ;;  %v1356_v23 = vmov 2475754826   ;;  %v1357_v25 = vmov 2131351028  }
   0xf   : > { %1282 = vmatprep.subr.mxu0 %v1351_v1  ;;  %1287 = vmatprep.subr.mxu1 %v1351_v1  ;;  %v1455_v5 = vmul.f32 6.2831855, %v382_v4  ;;  %v1358_v28 = vmov 1326507024  }
  0x10   : > { %1275 = vmatmul.mubr.msk.f32.vlgmr.msra.gmra.mxu0 %vm391_vm2, %v382_v4 }
  0x11   : > { %1283 = vmatpush3.msk.msra.mxu0 %vm395_vm0, %v755_v3  ;;  %1284 = vmatprep.mubr.msk.f32.mxu0 %vm1352_vm1, %v1351_v1  ;;  %v473_v6 = vand.u32 2139095040, %v1455_v5  ;;  %v470_v9 = vand.u32 2147483647, %v1455_v5  ;;  %vm472_vm10 = vcmp.lt.s32.totalorder %v1455_v5, 0 }
  0x12   : > { %1292 = vmatprep.subr.mxu0 %v1351_v1 }
  0x13   : > { %v474_v7 = vshrl.u32 %v473_v6, 23  ;;  %v477_v12 = vand.u32 8388607, %v470_v9  ;;  %vm471_vm11 = vcmp.le.f32.partialorder %v470_v9, 0.7853982 }
  0x15   : > { %v1229_v8 = vadd.s32 4294967169, %v474_v7  ;;  %v478_v20 = vor.u32 8388608, %v477_v12 }
  0x17   : > { %v480_v10 = vadd.s32 1, %v1229_v8  ;;  %v518_v39 = vshll.u32 %v478_v20, 8 }
  0x19   : > { %vm481_vm3 = vcmp.gt.s32.totalorder %v480_v10, 0 }
  0x1a   : > { %v482_v11 = vsel %vm481_vm3, %v480_v10, 0 }
  0x1b   : > { %v484_v13 = vand.u32 31, %v482_v11  ;;  %v483_v14 = vshrl.u32 %v482_v11, 5 }
  0x1d   : > { %v485_v15 = vsub.s32 32, %v484_v13  ;;  %v496_v17 = vshll.u32 %v1353_v16, %v484_v13  ;;  %v499_v19 = vshll.u32 %v1354_v18, %v484_v13  ;;  %v487_v22 = vshll.u32 %v1355_v21, %v484_v13 }
  0x1e   : > { %v490_v24 = vshll.u32 %v1356_v23, %v484_v13  ;;  %v493_v26 = vshll.u32 %v1357_v25, %v484_v13  ;;  %vm505_vm4 = vcmp.lt.s32.totalorder %v483_v14, 4  ;;  %vm502_vm5 = vcmp.lt.s32.totalorder %v483_v14, 1 }
  0x1f   : > { %v497_v27 = vshrl.u32 %v1354_v18, %v485_v15  ;;  %v500_v29 = vshrl.u32 %v1358_v28, %v485_v15  ;;  %v486_v30 = vshrl.u32 %v1355_v21, %v485_v15  ;;  %v488_v31 = vshrl.u32 %v1356_v23, %v485_v15 }
  0x20   : > { %v491_v32 = vshrl.u32 %v1357_v25, %v485_v15  ;;  %v494_v33 = vshrl.u32 %v1353_v16, %v485_v15  ;;  %vm504_vm6 = vcmp.lt.s32.totalorder %v483_v14, 3  ;;  %vm503_vm7 = vcmp.lt.s32.totalorder %v483_v14, 2 }
  0x21   : > { %v498_v34 = vor.u32 %v497_v27, %v496_v17  ;;  %v501_v35 = vor.u32 %v500_v29, %v499_v19  ;;  %v489_v36 = vor.u32 %v488_v31, %v487_v22 }
  0x22   : > { %v492_v37 = vor.u32 %v491_v32, %v490_v24  ;;  %v495_v38 = vor.u32 %v494_v33, %v493_v26 }
  0x23   : > { %v511_v40 = vsel %vm505_vm4, %v498_v34, 920167782  ;;  %v515_v41 = vsel %vm505_vm4, %v501_v35, 1326507024  ;;  %v506_v42 = vsel %vm502_vm5, %v486_v30, %v489_v36 }
  0x24   : > { %v507_v43 = vsel %vm505_vm4, %v495_v38, 2102212464  ;;  %v510_v44 = vsel %vm502_vm5, %v489_v36, %v492_v37  ;;  %v512_v45 = vsel %vm504_vm6, %v495_v38, %v511_v40  ;;  %v514_v46 = vsel %vm502_vm5, %v492_v37, %v495_v38  ;;  %v838_v38 = vld [vmem:[%s1556_s4] sm:$0xf] }
  0x25   : > { %v508_v47 = vsel %vm504_vm6, %v492_v37, %v507_v43  ;;  %v513_v48 = vsel %vm503_vm7, %v510_v44, %v512_v45  ;;  %v516_v49 = vsel %vm504_vm6, %v498_v34, %v515_v41  ;;  %vm562_vm5 = vweird.f32 %v1455_v5 }
  0x26   : > { %v509_v50 = vsel %vm503_vm7, %v506_v42, %v508_v47  ;;  %v517_v51 = vsel %vm503_vm7, %v514_v46, %v516_v49  ;;  %v1465_v52 = vmul.u32.u64.low %v518_v39, %v513_v48  ;;  %v1466_v53 = vmul.u32.u64.high %v518_v39, %v513_v48, %v1465_v52  ;;  %v998_v46 = vld [vmem:[%s1559_s7 + $0x18] sm:$0xff]  ;;  %v997_v47 = vld [vmem:[%s1559_s7 + $0x10] sm:$0xff]  ;;  %v996_v48 = vld [vmem:[%s1559_s7 + $0x8] sm:$0xff] }
  0x27   : > { %v1468_v54 = vmul.u32.u64.low %v518_v39, %v517_v51  ;;  %v1469_v55 = vmul.u32.u64.high %v518_v39, %v517_v51, %v1468_v54  ;;  %v525_v56 = vmul.u32 %v518_v39, %v509_v50  ;;  %v916_v39 = vld [vmem:[%s1557_s5] sm:$0xf]  ;;  %v1084_v50 = vld [vmem:[%s1561_s9 + $0x18] sm:$0xff] }
  0x28   : > { %v528_v57 = vadd.s32 1, %v1466_v53  ;;  %v995_v49 = vld [vmem:[%s1559_s7] sm:$0xff] }
  0x29   : > { %vm527_vm8 = vc.u32 %v1469_v55, %v1465_v52  ;;  %v526_v6 = vadd.s32 %v1465_v52, %v1469_v55 }
  0x2a   : > { %v529_v58 = vsel %vm527_vm8, %v528_v57, %v1466_v53  ;;  %v1226_v53 = vld [vmem:[%s1558_s6] ss:$0 sm:$0xff] }
  0x2b   : > { %v530_v59 = vadd.s32 %v529_v58, %v525_v56 }
  0x2d   : > { %v531_v60 = vadd.s32 536870912, %v530_v59 }
  0x2f   : > { %v532_v61 = vshrl.u32 %v531_v60, 30 }
  0x31   : > { %v533_v62 = vshll.u32 %v532_v61, 30  ;;  %v556_v20 = vsub.s32 4, %v532_v61 }
  0x33   : > { %v534_v63 = vsub.s32 %v530_v59, %v533_v62  ;;  %v557_v23 = vsel %vm472_vm10, %v556_v20, %v532_v61 }
  0x34   : > { %v559_v25 = vsel %vm471_vm11, 0, %v557_v23 }
  0x35   : > { %v536_v0 = vsub.s32 0, %v534_v63  ;;  %v666_v26 = vadd.s32 3, %v559_v25  ;;  %v563_v27 = vand.u32 3, %v559_v25 }
  0x37   : > { %v1230_v2 = vmin.u32 %v536_v0, %v534_v63  ;;  %v667_v28 = vand.u32 3, %v666_v26  ;;  %vm568_vm12 = vcmp.eq.s32.totalorder %v563_v27, 2  ;;  %vm565_vm14 = vcmp.eq.s32.totalorder %v563_v27, 0 }
  0x38   : > { %vm564_vm3 = vcmp.lt.s32.totalorder %v563_v27, 2 }
  0x39   : > { %v538_v3 = vclz %v1230_v2  ;;  %vm672_vm13 = vcmp.eq.s32.totalorder %v667_v28, 2  ;;  %vm669_vm15 = vcmp.eq.s32.totalorder %v667_v28, 0  ;;  %vm668_vm4 = vcmp.lt.s32.totalorder %v667_v28, 2 }
  0x3b   : > { %v1231_v4 = vadd.s32 4294967294, %v538_v3 }
  0x3d   : > { %vm1232_vm9 = vcmp.lt.s32.totalorder %v1231_v4, 0 }
  0x3e   : > { %v541_v7 = vsel %vm1232_vm9, 0, %v1231_v4 }
  0x3f   : > { %v542_v8 = vsub.s32 32, %v541_v7  ;;  %v543_v10 = vshll.u32 %v534_v63, %v541_v7  ;;  %v546_v11 = vsub.s32 4294967266, %v541_v7  ;;  %v1082_v7 = vld [vmem:[%s1561_s9 + $0x8] sm:$0xff] }
  0x41   : > { %v544_v12 = vshrl.u32 %v526_v6, %v542_v8  ;;  %v547_v13 = vadd.s32 127, %v546_v11  ;;  %v1083_v6 = vld [vmem:[%s1561_s9 + $0x10] sm:$0xff]  ;;  %v1081_v8 = vld [vmem:[%s1561_s9] sm:$0xff] }
  0x43   : > { %v545_v14 = vor.u32 %v544_v12, %v543_v10  ;;  %v548_v15 = vshll.u32 %v547_v13, 23  ;;  %v1246_v10 = vld [vmem:[%s1560_s8] ss:$0 sm:$0xff] }
  0x45   : > { %v549_v16 = vor.u32 4788187, %v548_v15  ;;  %v552_v17 = vcvt.s32.f32 %v545_v14  ;;  %v1248_v15 = vld [vmem:[%s1562_s10] ss:$0 sm:$0xff] }
  0x47   : > { %v550_v18 = vand.u32 2147483647, %v549_v16 }
  0x49   : > { %v553_v19 = vmul.f32 %v552_v17, %v550_v18 }
  0x4b   : > { %v554_v21 = vxor.u32 2147483648, %v553_v19 }
  0x4d   : > { %v555_v22 = vsel %vm472_vm10, %v554_v21, %v553_v19 }
  0x4e   : > { %v558_v24 = vsel %vm471_vm11, %v1455_v5, %v555_v22 }
  0x4f   : > { %1339 = vcosq.f32 %v558_v24 }
  0x50   : > { %1341 = vsinq.f32 %v558_v24 }
  0x5c   : > { %v1340_v29 = vpop.eup %1339 }
  0x5d   : > { %v1342_v30 = vpop.eup %1341  ;;  %v569_v31 = vxor.u32 2147483648, %v1340_v29 }
  0x5e   : > { %v566_v9 = vxor.u32 2147483648, %v1342_v30 }
  0x5f   : > { %v570_v32 = vsel %vm568_vm12, %v569_v31, %v1342_v30  ;;  %v674_v33 = vsel %vm672_vm13, %v569_v31, %v1342_v30 }
  0x60   : > { %v567_v34 = vsel %vm565_vm14, %v1340_v29, %v566_v9  ;;  %v671_v35 = vsel %vm669_vm15, %v1340_v29, %v566_v9 }
  0x61   : > { %v571_v36 = vsel %vm564_vm3, %v567_v34, %v570_v32  ;;  %v675_v37 = vsel %vm668_vm4, %v671_v35, %v674_v33 }
  0x62   : > { %v572_v40 = vsel %vm562_vm5, nan, %v571_v36  ;;  %v676_v41 = vsel %vm562_vm5, nan, %v675_v37 }
  0x63   : > { %1280 = vmatmul.mubr.msk.f32.vlgmr.msra.gmra.mxu1 %vm391_vm2, %v572_v40  ;;  %v833_v42 = vmul.f32 2.0, %v572_v40  ;;  %v836_v5 = vmul.f32 2.0, %v676_v41  ;;  %1285 = vmatmul.mubr.msk.f32.vlgmr.msra.gmra.mxu0 %vm391_vm2, %v676_v41 }
  0x64   : > { %1288 = vmatpush3.msk.msra.mxu1 %vm395_vm0, %v838_v38  ;;  %1293 = vmatpush3.msk.msra.mxu0 %vm395_vm0, %v916_v39  ;;  %vm1006_vm0 = vcmask 261120  }
  0x65   : > { %v834_v43 = vmul.f32 %v833_v42, %v572_v40  ;;  %v837_v44 = vmul.f32 %v836_v5, %v572_v40  ;;  %1289 = vmatprep.mubr.msk.f32.mxu1 %vm1352_vm1, %v1351_v1  ;;  %1294 = vmatprep.mubr.msk.f32.mxu0 %vm1352_vm1, %v1351_v1 }
  0x66   : > { %1297 = vmatprep.subr.mxu1 %v1351_v1  ;;  %1308 = vmatprep.subr.mxu0 %v1351_v1 }
  0x67   : > { %v1241_v45 = vadd.f32 -1.0, %v834_v43  ;;  %1295 = vmatmul.mubr.msk.f32.vlgmr.msra.gmra.mxu0 %vm391_vm2, %v837_v44 }
  0x68   : > { %1316 = vmatprep.mubr.msk.f32.mxu0 %vm1352_vm1, %v1351_v1  ;;  %1309 = vmatpush3.msra.mxu0 %v1084_v50 }
  0x69   : > { %1290 = vmatmul.mubr.msk.f32.vlgmr.msra.gmra.mxu1 %vm391_vm2, %v1241_v45  ;;  %1310 = vmatprep.subr.mxu0 %v1351_v1 }
  0x6a   : > { %1305 = vmatprep.mubr.msk.f32.mxu1 %vm1352_vm1, %v1351_v1  ;;  %1298 = vmatpush3.msra.mxu1 %v998_v46 }
  0x6b   : > { %1299 = vmatprep.subr.mxu1 %v1351_v1  ;;  %1311 = vmatpush3.msra.mxu0 %v1083_v6 }
  0x6c   : > { %1300 = vmatpush3.msra.mxu1 %v997_v47  ;;  %1312 = vmatprep.subr.mxu0 %v1351_v1 }
  0x6d   : > { %1301 = vmatprep.subr.mxu1 %v1351_v1  ;;  %1313 = vmatpush3.msra.mxu0 %v1082_v7 }
  0x6e   : > { %1302 = vmatpush3.msra.mxu1 %v996_v48  ;;  %1314 = vmatprep.subr.mxu0 %v1351_v1 }
  0x6f   : > { %1303 = vmatprep.subr.mxu1 %v1351_v1  ;;  %1315 = vmatpush3.msra.mxu0 %v1081_v8 }
  0x70   : > { %1304 = vmatpush3.msra.mxu1 %v995_v49 }
  0xd0   : > { %v465_v51 = vpop.f32.mrf.mxu0 }
  0xd1   : > { %v466_v54 = vadd.f32 %v1226_v53, %v465_v51 }
  0xd2   : > { %v1276_v52 = vpop.f32.mrf.mxu0 }
 0x123   : > { %v750_v55 = vpop.f32.mrf.mxu1  ;;  %v828_v56 = vpop.f32.mrf.mxu0 }
 0x124   : > { %v754_v57 = vadd.f32 %v750_v55, %v466_v54 }
 0x125   : > { %v1281_v58 = vpop.f32.mrf.mxu1  ;;  %v1286_v59 = vpop.f32.mrf.mxu0 }
 0x126   : > { %v832_v60 = vadd.f32 %v828_v56, %v754_v57 }
 0x127   : > { %v989_v61 = vpop.f32.mrf.mxu0 }
 0x129   : > { %v911_v62 = vpop.f32.mrf.mxu1  ;;  %v1296_v63 = vpop.f32.mrf.mxu0 }
 0x12a   : > { %v915_v0 = vadd.f32 %v911_v62, %v832_v60 }
 0x12b   : > { %v1291_v2 = vpop.f32.mrf.mxu1 }
 0x12c   : > { %v993_v3 = vadd.f32 %v989_v61, %v915_v0 }
 0x12e   : > { %v994_v4 = vmax.f32 %v993_v3, 0.0 }
 0x130   : > { %1306 = vmatmul.mubr.msk.f32.vlgmr.msra.gmra.mxu1 %vm1006_vm0, %v994_v4 }
 0x1f0   : > { %v1076_v11 = vpop.f32.mrf.mxu1 }
 0x1f1   : > { %v1077_v12 = vadd.f32 %v1246_v10, %v1076_v11 }
 0x1f2   : > { %v1307_v13 = vpop.f32.mrf.mxu1 }
 0x1f3   : > { %v1080_v14 = vmax.f32 %v1077_v12, 0.0 }
 0x1f5   : > { %1317 = vmatmul.mubr.msk.f32.vlgmr.msra.gmra.mxu0 %vm1006_vm0, %v1080_v14 }
 0x2b5   : > { %v1161_v1 = vpop.f32.mrf.mxu0 }
 0x2b6   : > { %v1162_v16 = vadd.f32 %v1248_v15, %v1161_v1 }
 0x2b7   : > { %v1318_v17 = vpop.f32.mrf.mxu0 }
 0x2b8   : > { %1165 = vst.msk [vmem:[%s381_s25] sm:$0xff] %vm391_vm2, %v1162_v16 }
 0x2b9 PF: > { %s21_s17 = sadd.s32 1, %s1349_s17  }
 0x2ba   : > { %p18_p4 = scmp.ge.s32.totalorder %s21_s17, 4  }
 0x2bc   :  { %20 = sbr.rel (!%p18_p4) target bundleno = 1 (0x1), region = 94 }

</bundles_post_ra>
